<compile_context>
chip_gen: v5e
topology: v5e:2x2
jax: 0.10.0
libtpu: 0.0.40
codegen_flags: <defaults>
</compile_context>

<pallas_src>
import jax
import jax.numpy as jnp
from jax import lax
from jax.experimental import pallas as pl
from jax.experimental.pallas import tpu as pltpu

NEG_SLOPE = 0.2        # LeakyReLU slope of GATv1 attention
MASK_VALUE = -9e15     # additive mask sentinel for non-edges
LANE = 128             # TPU lane width


# ---------------------------------------------------------------------------
# Generation-aware configuration
# ---------------------------------------------------------------------------
def _tpu_config():
    try:
        kind = jax.devices()[0].device_kind.lower()
    except Exception:
        kind = ""
    pre_v6 = any(g in kind for g in ("v2", "v3", "v4", "v5"))
    big_vmem = pre_v6 or ("v6" in kind)            # 128 MiB VMEM generations
    return {
        "block_cap": 512 if big_vmem else 256,     # bigger tiles where VMEM allows
        "vmem_bytes": (100 if big_vmem else 48) * 1024 * 1024,
        "min_blocks": 1 if big_vmem else 2,        # keep both v7x TCs busy
        "bf16_exp": not pre_v6,                    # v5e has no bf16 EUP/VPU
    }


def _compiler_params(cfg):
    return pltpu.CompilerParams(
        dimension_semantics=("parallel",),         # row blocks are independent
        vmem_limit_bytes=cfg["vmem_bytes"],
    )


def _row_block(n, cfg):
    cap = cfg["block_cap"]
    if cfg["min_blocks"] > 1 and n > 64:
        per_core = -(-n // cfg["min_blocks"])
        per_core = max(64, ((per_core + 63) // 64) * 64)   # 64-aligned (int8 safe)
        cap = min(cap, per_core)
    return min(cap, n)


def _band_width(n_heads, f_head):
    # Per-head band: [f_head features | 1 denominator column | zero padding],
    # with total width rounded up to a multiple of 128 lanes.
    tot = max(n_heads * (f_head + 1), LANE)
    tot = ((tot + LANE - 1) // LANE) * LANE
    assert tot % n_heads == 0
    return tot // n_heads


# ---------------------------------------------------------------------------
# Projection kernel: one matmul produces the banded features, the per-band
# ones (denominator) column (via the bias row) and the e_src/e_dst logit terms.
# ---------------------------------------------------------------------------
def _proj_kernel(x_ref, w_ref, b_ref, hb_ref, ea_ref):
    h = jnp.dot(x_ref[...], w_ref[...], preferred_element_type=jnp.float32)
    h = h + b_ref[...]
    tot = hb_ref.shape[1]
    hb_ref[...] = h[:, :tot].astype(hb_ref.dtype)     # banded features (bf16)
    ea_ref[...] = h[:, tot:].astype(ea_ref.dtype)     # [e_src | e_dst] (f32)


def project(x, w_full, bias, tot, cfg):
    n, fin = x.shape
    width = w_full.shape[1]
    extra = width - tot
    br = _row_block(n, cfg)
    return pl.pallas_call(
        _proj_kernel,
        grid=(pl.cdiv(n, br),),
        in_specs=[
            pl.BlockSpec((br, fin), lambda i: (i, 0)),
            pl.BlockSpec((fin, width), lambda i: (0, 0)),   # resident weights
            pl.BlockSpec((1, width), lambda i: (0, 0)),     # resident bias row
        ],
        out_specs=(
            pl.BlockSpec((br, tot), lambda i: (i, 0)),
            pl.BlockSpec((br, extra), lambda i: (i, 0)),
        ),
        out_shape=(
            jax.ShapeDtypeStruct((n, tot), jnp.bfloat16),
            jax.ShapeDtypeStruct((n, extra), jnp.float32),
        ),
        compiler_params=_compiler_params(cfg),
    )(x, w_full, bias)


# ---------------------------------------------------------------------------
# Attention kernel: masked multi-head softmax + aggregation + epilogue,
# gridded over blocks of query rows; heads run in a fori_loop.
# ---------------------------------------------------------------------------
def _make_attn_kernel(n_heads, f_head, band, apply_elu, log_softmax_valid,
                      bf16_exp):
    tot = n_heads * band

    def kernel(adj_ref, esrc_ref, edstT_ref, hb_ref, out_ref):
        br = out_ref.shape[0]
        # Additive mask bias, computed once per row block (hoisted out of the
        # head loop).  Non-edges get -9e15; for fully-isolated rows this gives
        # a (harmless) finite softmax over the raw logits.
        bias = jnp.where(adj_ref[...] != 0, 0.0, MASK_VALUE)        # (br, N) f32
        esrc = esrc_ref[...]                                         # (br, H) f32
        hb = hb_ref[...]                                             # (N, tot) bf16

        head_iota = lax.broadcasted_iota(jnp.int32, (1, n_heads), 1)
        band_col = lax.broadcasted_iota(jnp.int32, (1, tot), 1) // band

        def head_body(k, acc):
            # per-row source logit of head k -> (br, 1)
            e_s = jnp.sum(jnp.where(head_iota == k, esrc, 0.0),
                          axis=1, keepdims=True)
            # per-neighbor destination logit of head k -> (1, N)
            e_d = edstT_ref[pl.ds(k, 1), :]
            e = e_s + e_d                                            # (br, N)
            e = jnp.where(e > 0, e, NEG_SLOPE * e) + bias            # LeakyReLU+mask
            m = jnp.max(e, axis=1, keepdims=True)
            if bf16_exp:
                p = jnp.exp((e - m).astype(jnp.bfloat16))            # bf16 EUP
            else:
                p = jnp.exp(e - m).astype(jnp.bfloat16)
            # Zero every band except head k's; MXU cost is the same as the
            # narrow per-head matmul (F=8 already pads to 128/256 lanes).
            hb_k = jnp.where(band_col == k, hb, jnp.zeros_like(hb))  # (N, tot)
            return acc + jnp.dot(p, hb_k, preferred_element_type=jnp.float32)

        acc = lax.fori_loop(0, n_heads, head_body,
                            jnp.zeros((br, tot), jnp.float32))

        # Broadcast each band's denominator (its ones column) across the band
        # with one small selector matmul, then do one deferred normalization.
        r = lax.broadcasted_iota(jnp.int32, (tot, tot), 0)
        c = lax.broadcasted_iota(jnp.int32, (tot, tot), 1)
        sel = ((r % band == f_head) & (r // band == c // band)).astype(jnp.float32)
        denom = jnp.dot(acc, sel, preferred_element_type=jnp.float32)
        out = acc * pl.reciprocal(denom, approx=True)

        if apply_elu:
            out = jnp.where(out > 0, out, jnp.exp(jnp.minimum(out, 0.0)) - 1.0)

        if log_softmax_valid is not None:
            # log-softmax over the first `log_softmax_valid` (real) columns of
            # the lane-padded output slab.
            col = lax.broadcasted_iota(jnp.int32, out.shape, 1)
            valid = col < log_softmax_valid
            z = jnp.where(valid, out, MASK_VALUE)
            z = z - jnp.max(z, axis=1, keepdims=True)
            s = jnp.sum(jnp.where(valid, jnp.exp(z), 0.0), axis=1, keepdims=True)
            out = z - jnp.log(s)

        out_ref[...] = out.astype(out_ref.dtype)

    return kernel


def gat_attention(adj_i8, esrc, edstT, hb, *, n_heads, f_head, band, cfg,
                  apply_elu=False, log_softmax_valid=None,
                  out_dtype=jnp.float32):
    n = adj_i8.shape[0]
    tot = n_heads * band
    br = _row_block(n, cfg)
    kernel = _make_attn_kernel(n_heads, f_head, band, apply_elu,
                               log_softmax_valid, cfg["bf16_exp"])
    return pl.pallas_call(
        kernel,
        grid=(pl.cdiv(n, br),),
        in_specs=[
            pl.BlockSpec((br, n), lambda i: (i, 0)),            # int8 adjacency rows
            pl.BlockSpec((br, n_heads), lambda i: (i, 0)),      # e_src of query rows
            pl.BlockSpec((n_heads, n), lambda i: (0, 0)),       # e_dst^T, resident
            pl.BlockSpec((n, tot), lambda i: (0, 0)),           # banded h, resident
        ],
        out_specs=pl.BlockSpec((br, tot), lambda i: (i, 0)),
        out_shape=jax.ShapeDtypeStruct((n, tot), out_dtype),
        compiler_params=_compiler_params(cfg),
    )(adj_i8, esrc, edstT, hb)


# ---------------------------------------------------------------------------
# Weight packing helpers (plain JAX, run once on tiny parameter arrays)
# ---------------------------------------------------------------------------
def _layer_weights(w, a_src, a_dst, band):
    """w: (fin, H*F); a_src/a_dst: (H, F).
    Returns (w_full, bias) with
      w_full columns [k*band, k*band+F): head-k projection
      bias at column k*band+F = 1       : per-band denominator ones column
      trailing 2H columns                : e_src_k / e_dst_k logit terms.
    """
    fin = w.shape[0]
    h, f = a_src.shape
    tot = h * band
    wb = jnp.zeros((fin, tot), jnp.float32)
    bias = jnp.zeros((1, tot + 2 * h), jnp.float32)
    for k in range(h):
        wb = wb.at[:, k * band:k * band + f].set(w[:, k * f:(k + 1) * f])
        bias = bias.at[0, k * band + f].set(1.0)
    e_src_cols = jnp.stack([w[:, k * f:(k + 1) * f] @ a_src[k] for k in range(h)],
                           axis=1)
    e_dst_cols = jnp.stack([w[:, k * f:(k + 1) * f] @ a_dst[k] for k in range(h)],
                           axis=1)
    w_full = jnp.concatenate([wb, e_src_cols, e_dst_cols], axis=1)
    return w_full, bias


def _expand_rows(w, n_heads, f_head, band):
    """Expand (H*F, C) weight rows to match a banded (H*band)-wide input."""
    pieces = []
    for k in range(n_heads):
        pieces.append(w[k * f_head:(k + 1) * f_head])
        pieces.append(jnp.zeros((band - f_head, w.shape[1]), w.dtype))
    return jnp.concatenate(pieces, axis=0)


# ---------------------------------------------------------------------------
# Parameter init + forward
# ---------------------------------------------------------------------------
def init_params(key, in_dim, out_dim, hidden=64, heads=8):
    assert hidden % heads == 0
    f_head = hidden // heads

    def glorot(k, shape):
        s = jnp.sqrt(6.0 / (shape[0] + shape[-1]))
        return jax.random.uniform(k, shape, jnp.float32, -s, s)

    k1, k2, k3, k4, k5, k6 = jax.random.split(key, 6)
    return {
        # gat_conv1: in_dim -> 64 total (8 heads x 8), concat
        "w1": glorot(k1, (in_dim, heads * f_head)),
        "a_src1": glorot(k2, (heads, f_head)),
        "a_dst1": glorot(k3, (heads, f_head)),
        # gat_conv2: 64 -> out_dim, 1 head, no concat
        "w2": glorot(k4, (hidden, out_dim)),
        "a_src2": glorot(k5, (1, out_dim)),
        "a_dst2": glorot(k6, (1, out_dim)),
    }


def gat_net_forward(params, x, edge_index, num_nodes, *, heads=8, hidden=64):
    cfg = _tpu_config()
    out_dim = params["w2"].shape[1]
    f1 = hidden // heads
    band1 = _band_width(heads, f1)        # 16  -> 8 bands of 16 lanes
    band2 = _band_width(1, out_dim)       # 128 -> one 128-lane band
    tot1, tot2 = heads * band1, band2

    # Dense symmetric adjacency as int8 (4x less HBM<->VMEM traffic than f32);
    # the sparse scatter stays in plain-JAX glue.
    adj = jnp.zeros((num_nodes, num_nodes), jnp.int8)
    adj = adj.at[edge_index[0], edge_index[1]].set(1)
    adj = adj.at[edge_index[1], edge_index[0]].set(1)

    # dropout(p=0.6) -> identity in eval mode.

    # ---- layer 1: in_dim -> 64 (8 heads x 8, concat), then ELU --------------
    w1_full, b1 = _layer_weights(params["w1"], params["a_src1"],
                                 params["a_dst1"], band1)
    hb1, ea1 = project(x.astype(jnp.bfloat16), w1_full.astype(jnp.bfloat16),
                       b1, tot1, cfg)
    esrc1, edstT1 = ea1[:, :heads], ea1[:, heads:].T
    x1 = gat_attention(adj, esrc1, edstT1, hb1,
                       n_heads=heads, f_head=f1, band=band1, cfg=cfg,
                       apply_elu=True, out_dtype=jnp.bfloat16)     # (N, 128) banded bf16

    # ---- layer 2: 64 -> out_dim (1 head), then log_softmax ------------------
    w2e = _expand_rows(params["w2"], heads, f1, band1)             # (128, out_dim)
    w2_full, b2 = _layer_weights(w2e, params["a_src2"], params["a_dst2"], band2)
    hb2, ea2 = project(x1, w2_full.astype(jnp.bfloat16), b2, tot2, cfg)
    esrc2, edstT2 = ea2[:, :1], ea2[:, 1:].T
    logp = gat_attention(adj, esrc2, edstT2, hb2,
                         n_heads=1, f_head=out_dim, band=band2, cfg=cfg,
                         log_softmax_valid=out_dim)                # (N, 128) f32
    return logp[:, :out_dim]


# ---------------------------------------------------------------------------
# Pure-JAX (f32) reference for validation
# ---------------------------------------------------------------------------
def reference_forward(params, x, edge_index, num_nodes, *, heads=8, hidden=64):
    f_head = hidden // heads
    adj = jnp.zeros((num_nodes, num_nodes), jnp.float32)
    adj = adj.at[edge_index[0], edge_index[1]].set(1.0)
    adj = adj.at[edge_index[1], edge_index[0]].set(1.0)
    mask = adj > 0

    def layer(h_in, w, a_src, a_dst, n_heads, f, concat):
        h = (h_in @ w).reshape(num_nodes, n_heads, f)
        e_src = jnp.einsum("nhf,hf->nh", h, a_src)
        e_dst = jnp.einsum("nhf,hf->nh", h, a_dst)
        e = e_src[:, None, :] + e_dst[None, :, :]                 # e[i, j, h]
        e = jnp.where(e > 0, e, NEG_SLOPE * e)
        e = jnp.where(mask[:, :, None], e, MASK_VALUE)
        alpha = jax.nn.softmax(e, axis=1)
        out = jnp.einsum("ijh,jhf->ihf", alpha, h)
        return out.reshape(num_nodes, n_heads * f) if concat else out.mean(axis=1)

    h1 = jax.nn.elu(layer(x, params["w1"], params["a_src1"], params["a_dst1"],
                          heads, f_head, True))
    out = layer(h1, params["w2"], params["a_src2"], params["a_dst2"],
                1, params["w2"].shape[1], False)
    return jax.nn.log_softmax(out, axis=1)


if __name__ == "__main__":
    N, IN_DIM, OUT_DIM = 16, 8, 4

    key = jax.random.PRNGKey(0)
    k_x, k_params = jax.random.split(key)

    x = jax.random.normal(k_x, (N, IN_DIM), jnp.float32)

    # deterministic small graph: ring edges + self-loops (symmetrized)
    src = jnp.concatenate([jnp.arange(N), jnp.arange(N)])
    dst = jnp.concatenate([(jnp.arange(N) + 1) % N, jnp.arange(N)])
    edge_index = jnp.stack([src, dst]).astype(jnp.int32)          # (2, 2N)

    params = init_params(k_params, IN_DIM, OUT_DIM)

    out = jax.block_until_ready(gat_net_forward(params, x, edge_index, N))

    assert out.shape == (N, OUT_DIM)
    assert bool(jnp.all(jnp.isfinite(out)))
    # log_softmax rows should sum to 1 in probability space
    assert jnp.allclose(jnp.sum(jnp.exp(out), axis=1), 1.0, atol=1e-4)

    # compare against the f32 pure-JAX reference (loose tol: bf16 MXU operands,
    # bf16 softmax probabilities, approx reciprocal)
    ref = jax.block_until_ready(reference_forward(params, x, edge_index, N))
    err = float(jnp.max(jnp.abs(out - ref)))
    assert jnp.allclose(out, ref, atol=2e-1), err

    print("KERNEL_OK")
</pallas_src>

<mosaic_0001>
module attributes {stable_mosaic.version = 11 : i64} {
  func.func @_proj_kernel(%arg0: i32, %arg1: memref<16x8xbf16, #tpu.memory_space<vmem>>, %arg2: memref<8x144xbf16, #tpu.memory_space<vmem>>, %arg3: memref<1x144xf32, #tpu.memory_space<vmem>>, %arg4: memref<16x128xbf16, #tpu.memory_space<vmem>>, %arg5: memref<16x16xf32, #tpu.memory_space<vmem>>) attributes {dimension_semantics = [#tpu.dimension_semantics<parallel>], iteration_bounds = array<i64: 1>, scalar_prefetch = 0 : i64, scratch_operands = 0 : i64, tpu.core_type = #tpu.core_type<tc>, window_params = [{transform_indices = @transform_0, window_bounds = array<i64: 16, 8>}, {pipeline_mode = #tpu.pipeline_mode<synchronous>, transform_indices = @transform_1, window_bounds = array<i64: 8, 144>}, {pipeline_mode = #tpu.pipeline_mode<synchronous>, transform_indices = @transform_2, window_bounds = array<i64: 1, 144>}, {transform_indices = @transform_3, window_bounds = array<i64: 16, 128>}, {transform_indices = @transform_4, window_bounds = array<i64: 16, 16>}]} {
    %c0 = arith.constant 0 : index
    %c0_0 = arith.constant 0 : index
    %0 = vector.load %arg1[%c0, %c0_0] : memref<16x8xbf16, #tpu.memory_space<vmem>>, vector<16x8xbf16>
    %c0_1 = arith.constant 0 : index
    %c0_2 = arith.constant 0 : index
    %1 = vector.load %arg2[%c0_1, %c0_2] : memref<8x144xbf16, #tpu.memory_space<vmem>>, vector<8x144xbf16>
    %cst = arith.constant dense<0.000000e+00> : vector<16x144xf32>
    %2 = tpu.matmul %0, %1, %cst {dimension_numbers = #tpu.dot_dimension_numbers<[1], [0], [0], [1], [0, 0, 1, 1], [], []>} : vector<16x8xbf16>, vector<8x144xbf16>, vector<16x144xf32> -> vector<16x144xf32>
    %c0_3 = arith.constant 0 : index
    %c0_4 = arith.constant 0 : index
    %3 = vector.load %arg3[%c0_3, %c0_4] : memref<1x144xf32, #tpu.memory_space<vmem>>, vector<1x144xf32>
    %4 = vector.broadcast %3 : vector<1x144xf32> to vector<16x144xf32>
    %5 = arith.addf %2, %4 : vector<16x144xf32>
    %6 = vector.extract_strided_slice %5 {offsets = [0, 0], sizes = [16, 128], strides = [1, 1]} : vector<16x144xf32> to vector<16x128xf32>
    %7 = arith.truncf %6 : vector<16x128xf32> to vector<16x128xbf16>
    %c0_5 = arith.constant 0 : index
    %c0_6 = arith.constant 0 : index
    %8 = vector.load %arg4[%c0_5, %c0_6] : memref<16x128xbf16, #tpu.memory_space<vmem>>, vector<16x128xbf16>
    tpu.vector_store %arg4[%c0_5, %c0_6], %7 {strides = array<i32>} : memref<16x128xbf16, #tpu.memory_space<vmem>>, vector<16x128xbf16>,
    %9 = vector.extract_strided_slice %5 {offsets = [0, 128], sizes = [16, 16], strides = [1, 1]} : vector<16x144xf32> to vector<16x16xf32>
    %c0_7 = arith.constant 0 : index
    %c0_8 = arith.constant 0 : index
    %10 = vector.load %arg5[%c0_7, %c0_8] : memref<16x16xf32, #tpu.memory_space<vmem>>, vector<16x16xf32>
    tpu.vector_store %arg5[%c0_7, %c0_8], %9 {strides = array<i32>} : memref<16x16xf32, #tpu.memory_space<vmem>>, vector<16x16xf32>,
    return
  }
  func.func @transform_0(%arg0: i32) -> (i32, i32) {
    %c0_i32 = arith.constant 0 : i32
    %c0_i32_0 = arith.constant 0 : i32
    return %arg0, %c0_i32 : i32, i32
  }
  func.func @transform_1(%arg0: i32) -> (i32, i32) {
    %c0_i32 = arith.constant 0 : i32
    %c0_i32_0 = arith.constant 0 : i32
    %c0_i32_1 = arith.constant 0 : i32
    return %c0_i32, %c0_i32_0 : i32, i32
  }
  func.func @transform_2(%arg0: i32) -> (i32, i32) {
    %c0_i32 = arith.constant 0 : i32
    %c0_i32_0 = arith.constant 0 : i32
    %c0_i32_1 = arith.constant 0 : i32
    return %c0_i32, %c0_i32_0 : i32, i32
  }
  func.func @transform_3(%arg0: i32) -> (i32, i32) {
    %c0_i32 = arith.constant 0 : i32
    %c0_i32_0 = arith.constant 0 : i32
    return %arg0, %c0_i32 : i32, i32
  }
  func.func @transform_4(%arg0: i32) -> (i32, i32) {
    %c0_i32 = arith.constant 0 : i32
    %c0_i32_0 = arith.constant 0 : i32
    return %arg0, %c0_i32 : i32, i32
  }
}

</mosaic_0001>

<bundles_post_ra>
// kernel: tpu_custom_call.1
= control target key start
LH: loop header
LB: loop body
LE: loop exit
PB: predicated region body
PF: predicated region fallthrough
CT: control target
= control target key end

     0   :  { %10 = vsyncpa [#allocation3], 0  ;;  %s238_s0 = inlined_call_operand.vmem [shape: bf16[16,8], index: 0, kind: input, shape index: {}]   ;;  %s239_s1 = inlined_call_operand.vmem [shape: bf16[8,144], index: 1, kind: input, shape index: {}]   ;;  %s240_s2 = inlined_call_operand.vmem [shape: f32[1,144], index: 2, kind: input, shape index: {}]   ;;  %s241_s3 = inlined_call_operand.hbm [shape: bf16[16,128], index: 3, kind: output, shape index: {0}]   ;;  %s242_s4 = inlined_call_operand.hbm [shape: f32[16,16], index: 4, kind: output, shape index: {1}]  }
   0x1   :  { %v21_v0 = vld [vmem:[%s239_s1] sm:$0xff] }
   0x2   :  { %v34_v1 = vunpack.c.l.b16 %v21_v0  ;;  %v35_v2 = vunpack.c.h.b16 %v21_v0 }
   0x3   :  { %11 = vsyncpa [#allocation5], 0  ;;  %vm42_vm0 = vcmask 1043456   ;;  %v126_v7 = vld [vmem:[%s238_s0] sm:$0xff]  ;;  %vm38_vm1 = vcmask 64512   ;;  %vm81_vm2 = vcmask 130048  }
   0x4   :  { %v36_v3 = vpack.c.b16 %v34_v1, %v34_v1  ;;  %v37_v4 = vpack.c.b16 %v35_v2, %v35_v2  ;;  %v22_v8 = vld [vmem:[%s240_s2] sm:$0x3]  ;;  %s190_s1 = smov [#allocation4]   ;;  %s103_s23 = sshll.u32 %s242_s4, 4  ;;  %s104_s23 = int_to_ptr.hbm [resolvable:$true] %s103_s23 }
   0x5   :  { %v25_v9 = vperm.slane %v22_v8, 1  ;;  %v24_v13 = vperm.slane %v22_v8, 0  ;;  %s101_s21 = sshll.u32 %s190_s1, 4  ;;  %s191_s24 = smov [#allocation2]   ;;  %s102_s21 = int_to_ptr.vmem [resolvable:$true] %s101_s21 }
   0x6   :  { %v44_v5 = vsel %vm42_vm0, %v36_v3, 0  ;;  %v47_v6 = vsel %vm42_vm0, %v37_v4, 0  ;;  %s88_s25 = sshll.u32 %s191_s24, 4  ;;  %s90_s2 = sshll.u32 %s241_s3, 4  ;;  %s89_s25 = int_to_ptr.vmem [resolvable:$true] %s88_s25  ;;  %s91_s2 = int_to_ptr.hbm [resolvable:$true] %s90_s2 }
   0x7   :  { %56 = vmatpush.bf16.msra.mxu0 %v44_v5  ;;  %70 = vmatpush.bf16.msra.mxu1 %v47_v6  ;;  %s192_s28 = smov 128   ;;  %s193_s4 = smov 8  }
   0x8   :  { %s194_s29 = smov 64   ;;  %s195_s30 = smov 4  }
   0xa   :  { %124 = vmatmul.msk.bf16.vlgmr.msra.gmra.mxu0 %vm38_vm1, %v126_v7  ;;  %125 = vmatmul.msk.bf16.vlgmr.msra.gmra.mxu1 %vm38_vm1, %v126_v7 }
  0x87   :  { %v58_v10 = vpop.f32.mrf.mxu0  ;;  %v72_v11 = vpop.f32.mrf.mxu1 }
  0x88   :  { %v73_v12 = vadd.f32 %v72_v11, %v25_v9  ;;  %v59_v16 = vadd.f32 %v58_v10, %v24_v13 }
  0x8a   :  { %82 = vst.msk [vmem:[#allocation4] sm:$0xff] %vm81_vm2, %v73_v12 }
  0x8f   :  { %v60_v14 = vpop.f32.mrf.mxu0  ;;  %v74_v15 = vpop.f32.mrf.mxu1 }
  0x90   :  { %v61_v17 = vadd.f32 %v60_v14, %v24_v13  ;;  %v75_v18 = vadd.f32 %v74_v15, %v25_v9 }
  0x92   :  { %v130_v19 = vpack.c.bf16 %v61_v17, %v59_v16  ;;  %83 = vst.msk [vmem:[#allocation4 + $0x8] sm:$0xff] %vm81_vm2, %v75_v18 }
  0x93   :  { %109 = dma.vmem_to_hbm [thread:$0]  %s102_s21, 256, %s104_s23, [#allocation5], %s192_s28, %s192_s28, %s193_s4  }
  0x94   :  { %131 = vst [vmem:[#allocation2] sm:$0xff] %v130_v19  }
  0x95   :  { %96 = dma.vmem_to_hbm [thread:$0]  %s89_s25, 128, %s91_s2, [#allocation3], %s194_s29, %s194_s29, %s195_s30  }
  0x96   :  { %186 = dma.done.wait [#allocation3], 128  }
  0x97   :  { %187 = vsyncadd [#allocation3], 4294967168 }
  0x98   :  { %188 = dma.done.wait [#allocation5], 256  }
  0x99   :  { %189 = vsyncadd [#allocation5], 4294967040 }
  0x9a   :  { %118 = vsyncpa [#allocation3], 1 }
  0x9b   :  { %119 = vsyncpa [#allocation5], 1 }

</bundles_post_ra>
